<compile_context>
chip_gen: v7x
topology: tpu7x:2x2x1
jax: 0.10.0
libtpu: 0.0.40
codegen_flags: <defaults>
</compile_context>

<pallas_src>
import jax
import jax.numpy as jnp
from jax.experimental import pallas as pl
from jax.experimental.pallas import tpu as pltpu


# ---------------------------------------------------------------------------
# Kernel: 1x1 conv as W @ X on an HW tile, plus fused per-(batch, channel) bias
# ---------------------------------------------------------------------------
def _conv1x1_bias_kernel(x_ref, w_ref, b_ref, o_ref):
    # x_ref: (1, Cin, T)   one batch's tile of flattened spatial columns
    # w_ref: (Cout, Cin)   1x1 conv weight (resident across grid steps)
    # b_ref: (1, Cout, 1)  fused bias: conv bias + theta/time embeddings, this batch
    # o_ref: (1, Cout, T)
    y = jnp.dot(w_ref[...], x_ref[0], preferred_element_type=jnp.float32)  # (Cout, T)
    o_ref[0] = (y + b_ref[0]).astype(o_ref.dtype)


# ---------------------------------------------------------------------------
# Tiny embedding MLPs (O(B*Cout) work) — plain JAX, fused into a single bias.
# ---------------------------------------------------------------------------
def _embedding_bias(theta, t, params):
    # theta branch: Linear -> exact GELU (erf) -> Linear   (matches F.gelu default)
    h = jnp.dot(theta, params["wth1"].T) + params["bth1"]
    h = jax.nn.gelu(h, approximate=False)
    th = jnp.dot(h, params["wth2"].T) + params["bth2"]
    # time branch: Linear -> Swish (x * sigmoid(x)) -> Linear
    g = jnp.dot(t, params["wt1"].T) + params["bt1"]
    g = g * jax.nn.sigmoid(g)
    tm = jnp.dot(g, params["wt2"].T) + params["bt2"]
    return th + tm                                            # (B, Cout)


def _pick_hw_tile(hw, cin, cout, itemsize=4, vmem_budget_bytes=8 * 1024 * 1024):
    """HW tile: whole extent when small (block == full dim is always legal),
    otherwise the largest multiple of 128 whose double-buffered in+out tiles
    fit a conservative VMEM budget (safe for v7x's 64 MiB VMEM)."""
    if hw <= 4096 and 2 * hw * (cin + cout) * itemsize <= vmem_budget_bytes:
        return hw
    per_col = 2 * (cin + cout) * itemsize          # double-buffered in + out column
    t = (vmem_budget_bytes // per_col) // 128 * 128
    return int(max(128, min(t, 2048)))


# ---------------------------------------------------------------------------
# Wrapper
# ---------------------------------------------------------------------------
def mlp_t_theta_forward(x_nchw, theta, t, params):
    B, Cin, H, W = x_nchw.shape
    Cout = params["conv_w"].shape[0]
    HW = H * W

    # Fused bias: conv bias + theta/time embeddings, shaped (B, Cout, 1).
    bias = (_embedding_bias(theta, t, params) + params["conv_b"][None, :])
    bias = bias.astype(jnp.float32).reshape(B, Cout, 1)

    # Channels-first, spatially flattened: pure reshape of NCHW (no transpose).
    x_bcs = x_nchw.reshape(B, Cin, HW)
    conv_w = params["conv_w"].reshape(Cout, Cin)

    T = _pick_hw_tile(HW, Cin, Cout)
    grid = (B, pl.cdiv(HW, T))

    out = pl.pallas_call(
        _conv1x1_bias_kernel,
        out_shape=jax.ShapeDtypeStruct((B, Cout, HW), jnp.float32),
        grid=grid,
        in_specs=[
            pl.BlockSpec((1, Cin, T), lambda b, j: (b, 0, j)),
            pl.BlockSpec((Cout, Cin), lambda b, j: (0, 0)),
            pl.BlockSpec((1, Cout, 1), lambda b, j: (b, 0, 0)),
        ],
        out_specs=pl.BlockSpec((1, Cout, T), lambda b, j: (b, 0, j)),
        compiler_params=pltpu.CompilerParams(
            dimension_semantics=("parallel", "parallel")),
    )(x_bcs, conv_w, bias)

    # (B, Cout, HW) -> NCHW is again just a reshape.
    return out.reshape(B, Cout, H, W)


# ---------------------------------------------------------------------------
# Pure-JAX reference (mirrors the PyTorch forward exactly)
# ---------------------------------------------------------------------------
def reference_forward(x, theta, t, params):
    Cout, Cin = params["conv_w"].shape[:2]
    w = params["conv_w"].reshape(Cout, Cin)
    y = jnp.einsum("bchw,oc->bohw", x, w) + params["conv_b"][None, :, None, None]

    th = jnp.dot(theta, params["wth1"].T) + params["bth1"]
    th = jax.nn.gelu(th, approximate=False)
    th = jnp.dot(th, params["wth2"].T) + params["bth2"]

    tm = jnp.dot(t, params["wt1"].T) + params["bt1"]
    tm = tm * jax.nn.sigmoid(tm)
    tm = jnp.dot(tm, params["wt2"].T) + params["bt2"]

    return y + th[:, :, None, None] + tm[:, :, None, None]


def init_params(key, in_channels, out_channels, t_channels, theta_channels):
    ks = jax.random.split(key, 10)
    s = 0.1
    return {
        # nn.Conv2d(in, out, 1): weight (out, in, 1, 1), bias (out,)
        "conv_w": s * jax.random.normal(ks[0], (out_channels, in_channels, 1, 1), jnp.float32),
        "conv_b": s * jax.random.normal(ks[1], (out_channels,), jnp.float32),
        # time_emb1 / time_emb2
        "wt1": s * jax.random.normal(ks[2], (out_channels, t_channels), jnp.float32),
        "bt1": s * jax.random.normal(ks[3], (out_channels,), jnp.float32),
        "wt2": s * jax.random.normal(ks[4], (out_channels, out_channels), jnp.float32),
        "bt2": s * jax.random.normal(ks[5], (out_channels,), jnp.float32),
        # theta_emb1 / theta_emb2
        "wth1": s * jax.random.normal(ks[6], (out_channels, theta_channels), jnp.float32),
        "bth1": s * jax.random.normal(ks[7], (out_channels,), jnp.float32),
        "wth2": s * jax.random.normal(ks[8], (out_channels, out_channels), jnp.float32),
        "bth2": s * jax.random.normal(ks[9], (out_channels,), jnp.float32),
    }


if __name__ == "__main__":
    # Small shapes consistent with the module's forward.
    B, Cin, Cout, H, W = 2, 4, 8, 16, 16
    t_channels, theta_channels = 8, 8
    # NOTE: mid_channels from __init__ is unused by the forward pass.

    key = jax.random.PRNGKey(0)
    kx, kth, kt, kp = jax.random.split(key, 4)

    x = jax.random.normal(kx, (B, Cin, H, W), jnp.float32)
    theta = jax.random.normal(kth, (B, theta_channels), jnp.float32)
    t = jax.random.normal(kt, (B, t_channels), jnp.float32)
    params = init_params(kp, Cin, Cout, t_channels, theta_channels)

    fwd = jax.jit(lambda x_, th_, t_: mlp_t_theta_forward(x_, th_, t_, params))
    out = jax.block_until_ready(fwd(x, theta, t))

    ref = jax.block_until_ready(reference_forward(x, theta, t, params))
    assert out.shape == (B, Cout, H, W), out.shape
    assert jnp.allclose(out, ref, atol=1e-4, rtol=1e-4), float(jnp.max(jnp.abs(out - ref)))

    print("KERNEL_OK")
</pallas_src>

<mosaic_0001>
module attributes {stable_mosaic.version = 11 : i64} {
  func.func @_conv1x1_bias_kernel(%arg0: i32, %arg1: i32, %arg2: memref<1x4x256xf32, #tpu.memory_space<vmem>>, %arg3: memref<8x4xf32, #tpu.memory_space<vmem>>, %arg4: memref<1x8x1xf32, #tpu.memory_space<vmem>>, %arg5: memref<1x8x256xf32, #tpu.memory_space<vmem>>) attributes {dimension_semantics = [#tpu.dimension_semantics<parallel>, #tpu.dimension_semantics<parallel>], iteration_bounds = array<i64: 2, 1>, scalar_prefetch = 0 : i64, scratch_operands = 0 : i64, tpu.core_type = #tpu.core_type<tc>, window_params = [{transform_indices = @transform_0, window_bounds = array<i64: 1, 4, 256>}, {pipeline_mode = #tpu.pipeline_mode<synchronous>, transform_indices = @transform_1, window_bounds = array<i64: 8, 4>}, {transform_indices = @transform_2, window_bounds = array<i64: 1, 8, 1>}, {transform_indices = @transform_3, window_bounds = array<i64: 1, 8, 256>}]} {
    %c0 = arith.constant 0 : index
    %c0_0 = arith.constant 0 : index
    %0 = vector.load %arg3[%c0, %c0_0] : memref<8x4xf32, #tpu.memory_space<vmem>>, vector<8x4xf32>
    %c0_1 = arith.constant 0 : index
    %c0_2 = arith.constant 0 : index
    %c0_3 = arith.constant 0 : index
    %1 = vector.load %arg2[%c0_1, %c0_2, %c0_3] : memref<1x4x256xf32, #tpu.memory_space<vmem>>, vector<1x4x256xf32>
    %2 = vector.shape_cast %1 : vector<1x4x256xf32> to vector<4x256xf32>
    %cst = arith.constant dense<0.000000e+00> : vector<8x256xf32>
    %3 = tpu.matmul %0, %2, %cst {dimension_numbers = #tpu.dot_dimension_numbers<[1], [0], [0], [1], [0, 0, 1, 1], [], []>} : vector<8x4xf32>, vector<4x256xf32>, vector<8x256xf32> -> vector<8x256xf32>
    %c0_4 = arith.constant 0 : index
    %c0_5 = arith.constant 0 : index
    %c0_6 = arith.constant 0 : index
    %4 = vector.load %arg4[%c0_4, %c0_5, %c0_6] : memref<1x8x1xf32, #tpu.memory_space<vmem>>, vector<1x8x1xf32>
    %5 = vector.shape_cast %4 : vector<1x8x1xf32> to vector<8x1xf32>
    %6 = vector.broadcast %5 : vector<8x1xf32> to vector<8x256xf32>
    %7 = arith.addf %3, %6 : vector<8x256xf32>
    %c0_7 = arith.constant 0 : index
    %c0_8 = arith.constant 0 : index
    %c0_9 = arith.constant 0 : index
    %8 = vector.load %arg5[%c0_7, %c0_8, %c0_9] : memref<1x8x256xf32, #tpu.memory_space<vmem>>, vector<1x8x256xf32>
    %9 = vector.shape_cast %8 : vector<1x8x256xf32> to vector<8x256xf32>
    %10 = vector.shape_cast %7 : vector<8x256xf32> to vector<1x8x256xf32>
    tpu.vector_store %arg5[%c0_7, %c0_8, %c0_9], %10 {strides = array<i32>} : memref<1x8x256xf32, #tpu.memory_space<vmem>>, vector<1x8x256xf32>,
    return
  }
  func.func @transform_0(%arg0: i32, %arg1: i32) -> (i32, i32, i32) {
    %c0_i32 = arith.constant 0 : i32
    %c0_i32_0 = arith.constant 0 : i32
    return %arg0, %c0_i32, %arg1 : i32, i32, i32
  }
  func.func @transform_1(%arg0: i32, %arg1: i32) -> (i32, i32) {
    %c0_i32 = arith.constant 0 : i32
    %c0_i32_0 = arith.constant 0 : i32
    %c0_i32_1 = arith.constant 0 : i32
    return %c0_i32, %c0_i32_0 : i32, i32
  }
  func.func @transform_2(%arg0: i32, %arg1: i32) -> (i32, i32, i32) {
    %c0_i32 = arith.constant 0 : i32
    %c0_i32_0 = arith.constant 0 : i32
    %c0_i32_1 = arith.constant 0 : i32
    return %arg0, %c0_i32, %c0_i32_0 : i32, i32, i32
  }
  func.func @transform_3(%arg0: i32, %arg1: i32) -> (i32, i32, i32) {
    %c0_i32 = arith.constant 0 : i32
    %c0_i32_0 = arith.constant 0 : i32
    return %arg0, %c0_i32, %arg1 : i32, i32, i32
  }
}

</mosaic_0001>

<bundles_post_ra>
// kernel: _lambda_.1
= control target key start
LH: loop header
LB: loop body
LE: loop exit
PB: predicated region body
PF: predicated region fallthrough
CT: control target
= control target key end

     0   :  { %s509_s12 = smov 0   ;;  %s511_s13 = smov 0   ;;  %s548_s0 = inlined_call_operand.vmem [shape: f32[2,4,256], index: 0, kind: input, shape index: {}]   ;;  %s549_s1 = inlined_call_operand.vmem [shape: f32[8,4], index: 1, kind: input, shape index: {}]   ;;  %s550_s2 = inlined_call_operand.vmem [shape: f32[2,8,1], index: 2, kind: input, shape index: {}]   ;;  %s551_s3 = inlined_call_operand.vmem [shape: f32[2,8,256], index: 3, kind: output, shape index: {}]  }
   0x1   :  { %s513_s14 = smov 0  }
   0x2 LB: > { %s25_s15 = sadd.s32 1, %s481_s13  ;;  %p422_p0 = scmp.ge.s32.totalorder %s485_s14, 1  ;;  %s485_s14 = sphi %s513_s14, %s13_s14   ;;  %s481_s13 = sphi %s511_s13, %s553_s13   ;;  %s477_s12 = sphi %s509_s12, %s552_s12  }
   0x3   : > { %p27_p1 = scmp.ge.s32.totalorder %s25_s15, 2  ;;  %p167_p2 = scmp.lt.s32.totalorder %s485_s14, 3 }
   0x5   : > { %s555_s15 = smov (%p27_p1, %s25_s15), 0  ;;  %p168_p3 = pnand %p422_p0, %p167_p2 }
   0x6   : > { %p204_p4 = scmp.lt.s32.totalorder (!%p168_p3), %s477_s12, 1  ;;  %v487_v0 = vmov (!%p168_p3), 0.0   ;;  %v488_v1 = vmov (!%p168_p3), 0   ;;  %vm241_vm0 = vcmask (!%p168_p3), 1043456   ;;  %v227_v5 = vld [vmem:[%s549_s1] sm:$0xff] (!%p168_p3)  ;;  %vm237_vm1 = vcmask (!%p168_p3), 31744  }
   0x7   : > { %171 = sbr.rel (%p168_p3) target bundleno = 238 (0xee), region = 32  ;;  %310 = vmatprep.mubr.f32.mxu0 (!%p168_p3), %v487_v0  ;;  %461 = vset.pattern.permute.xlu0 (!%p168_p3), %v488_v1 }
   0xe   : > { %s557_s12 = smov (!%p204_p4, %s477_s12), 1 }
   0xf   : > { %s433_s16 = sshll.u32 %s557_s12, 3  ;;  %s434_s25 = sshll.u32 %s557_s12, 4 }
  0x10   : > { %s211_s19 = scalar_lea.vmem %s548_s0, %s433_s16  ;;  %s216_s22 = scalar_lea.vmem %s550_s2, %s433_s16 }
  0x11   : > { %v228_v2 = vld [vmem:[%s211_s19] sm:$0xff]  ;;  %s225_s28 = scalar_lea.vmem %s551_s3, %s434_s25 }
  0x12   : > { %v229_v3 = vld [vmem:[%s216_s22] sm:$0xff]  ;;  %v236_v4 = vcombine.high %v228_v2, %v228_v2 }
  0x13   : > { %232 = vperm.xlu0 %461, %v229_v3  }
  0x14   : > { %428 = vmatprep.subr.msk.mxu0 %vm241_vm0, %v236_v4 }
  0x15   : > { %429 = vmatpush1.msk.msra.mxu0 %vm241_vm0, %v228_v2 }
  0x16   : > { %430 = vmatmul.mubr.msk.f32.vlgmr.msra.gmra.mrb[0].mxu0 %vm237_vm1, %v227_v5 }
  0x92   : > { %v233_v6 = vpop.permute.xlu0 %232 }
  0xe9   : > { %v312_v7 = vpop.f32.mrb[0].mxu0 }
  0xea   : > { %v313_v8 = vadd.f32 %v312_v7, %v233_v6  ;;  %v314_v9 = vpop.f32.mrb[1].mxu0 }
  0xeb   : > { %v315_v10 = vadd.f32 %v314_v9, %v233_v6 }
  0xec   : > { %317 = vst [vmem:[%s225_s28] sm:$0xff] %v313_v8 }
  0xed   : > { %318 = vst [vmem:[%s225_s28 + $0x8] sm:$0xff] %v315_v10 }
  0xee PF: > { %s13_s14 = sadd.s32 1, %s485_s14   ;;  %s552_s12 = smov %s481_s13 }
  0xef   : > { %p10_p5 = scmp.ge.s32.totalorder %s13_s14, 4   ;;  %s553_s13 = smov %s555_s15 }
  0xf1   :  { %12 = sbr.rel (!%p10_p5) target bundleno = 2 (0x2), region = 65 }

</bundles_post_ra>
